<compile_context>
chip_gen: v5e
topology: v5e:2x2
jax: 0.10.0
libtpu: 0.0.40
codegen_flags: <defaults>
</compile_context>

<pallas_src>
import math

import jax
import jax.numpy as jnp
from jax.experimental import pallas as pl
from jax.experimental.pallas import tpu as pltpu


def _net_kernel(scal_ref,            # SMEM (2,) f32: [c = wq*wk/sqrt(dim_k), wv]
                x_ref,               # VMEM (TB, L)
                w1t_ref, b1_ref,     # (L,  H1), (1, H1)
                w2t_ref, b2_ref,     # (H1, H2), (1, H2)
                w3t_ref, b3_ref,     # (H2, H3), (1, H3)
                wpt_ref, bp_ref,     # (H3, O),  (1, O)
                o_ref):              # VMEM (TB, O)
    x = x_ref[...]                                   # (TB, L), lane-dense rows
    c = scal_ref[0]
    wv = scal_ref[1]

    # ---- SelfAttention(1, 1, 1), rank-1 form (pure VPU/EUP/XLU work) --------
    s = (c * x)[:, :, None] * x[:, None, :]          # (TB, L, L) scores
    s = s - jnp.max(s, axis=-1, keepdims=True)       # numerically stable softmax
    e = jnp.exp(s)                                   # EUP
    denom = jnp.sum(e, axis=-1)                      # (TB, L) lane reduce
    num = jnp.sum(e * x[:, None, :], axis=-1)        # (TB, L) == (softmax @ x) * denom
    inv = pl.reciprocal(denom, approx=True)          # EUP slot, co-issues with VPU work
    inv = inv * (2.0 - denom * inv)                  # one Newton step -> ~f32 accuracy
    att = (wv * num) * inv                           # (TB, L) attention output

    # ---- MLP head (bias add broadcasts from (1, H)) --------------------------
    h1 = jnp.dot(att, w1t_ref[...], preferred_element_type=jnp.float32) + b1_ref[...]
    h2 = jnp.dot(h1, w2t_ref[...], preferred_element_type=jnp.float32) + b2_ref[...]
    h3 = jnp.dot(h2, w3t_ref[...], preferred_element_type=jnp.float32) + b3_ref[...]
    h3 = jnp.maximum(h3, 0.0)                        # F.relu
    out = jnp.dot(h3, wpt_ref[...], preferred_element_type=jnp.float32) + bp_ref[...]
    o_ref[...] = out.astype(o_ref.dtype)


def net_forward(x, params):
    """Fused Pallas forward of Net.

    x: (B, n_feature) f32.
    params: {"att": (wq, wk, wv)  each (1, 1) torch-Linear layout,
             "mlp": ((w1, b1), (w2, b2), (w3, b3), (wp, bp)) torch-Linear layout}.
    Returns (B, n_output).
    """
    wq, wk, wv = params["att"]
    (w1, b1), (w2, b2), (w3, b3), (wp, bp) = params["mlp"]

    B, L = x.shape
    H1, H2, H3, O = w1.shape[0], w2.shape[0], w3.shape[0], wp.shape[0]
    # Net uses SelfAttention(1, 1, 1); dim_q must be 1 for the rank-1 rewrite.
    assert wq.shape == (1, 1) and wk.shape == (1, 1) and wv.shape == (1, 1)
    assert w1.shape[1] == L and w2.shape[1] == H1 and w3.shape[1] == H2 and wp.shape[1] == H3

    dim_k = wq.shape[0]
    c = (wq[0, 0] * wk[0, 0]) / math.sqrt(dim_k)          # scalar score factor
    scalars = jnp.stack([c, wv[0, 0]]).astype(jnp.float32)  # (2,), lives in SMEM

    # Batch tile: multiple of 8 (f32 sublanes) when possible; TB == B is always legal.
    if B % 8 == 0:
        TB = 8
        # grow while it divides B, keeps >= 2 grid steps (megacore), and stays modest
        while TB < 128 and B % (TB * 2) == 0 and (B // (TB * 2)) >= 2:
            TB *= 2
    else:
        TB = B
    grid = (B // TB,)

    # Pre-transpose Linear weights once in the wrapper (layout plumbing, not compute).
    w1t, w2t, w3t, wpt = w1.T, w2.T, w3.T, wp.T
    b1r, b2r, b3r, bpr = (b.reshape(1, -1) for b in (b1, b2, b3, bp))

    def shared(shape):
        return pl.BlockSpec(shape, lambda b: (0, 0))       # resident across grid steps

    out = pl.pallas_call(
        _net_kernel,
        out_shape=jax.ShapeDtypeStruct((B, O), x.dtype),
        grid=grid,
        in_specs=[
            pl.BlockSpec(memory_space=pltpu.MemorySpace.SMEM),   # [c, wv] scalars
            pl.BlockSpec((TB, L), lambda b: (b, 0)),             # x rows (lane-dense)
            shared((L, H1)), shared((1, H1)),
            shared((H1, H2)), shared((1, H2)),
            shared((H2, H3)), shared((1, H3)),
            shared((H3, O)), shared((1, O)),
        ],
        out_specs=pl.BlockSpec((TB, O), lambda b: (b, 0)),
        compiler_params=pltpu.CompilerParams(
            dimension_semantics=("parallel",)),
    )(scalars, x, w1t, b1r, w2t, b2r, w3t, b3r, wpt, bpr)
    return out


def net_forward_ref(x, params):
    """Pure-JAX reference mirroring the PyTorch Net.forward."""
    wq, wk, wv = params["att"]
    (w1, b1), (w2, b2), (w3, b3), (wp, bp) = params["mlp"]
    dim_k = wq.shape[0]

    x_u = x[:, :, None]                                   # torch.unsqueeze(x, 2)
    q = x_u @ wq.T
    k = x_u @ wk.T
    v = x_u @ wv.T
    s = jnp.einsum("blk,bmk->blm", q, k) * (1.0 / math.sqrt(dim_k))
    p = jax.nn.softmax(s, axis=-1)
    att = jnp.squeeze(p @ v, axis=2)                      # torch.squeeze(., dim=2)

    h1 = att @ w1.T + b1
    h2 = h1 @ w2.T + b2
    h3 = jnp.maximum(h2 @ w3.T + b3, 0.0)
    return h3 @ wp.T + bp


if __name__ == "__main__":
    B, L = 16, 16                       # batch, n_feature (== attention sequence length)
    H1, H2, H3, O = 32, 32, 16, 4       # n_hidden1, n_hidden2, n_hidden3, n_output

    key = jax.random.PRNGKey(0)
    keys = jax.random.split(key, 12)
    x = jax.random.normal(keys[0], (B, L), dtype=jnp.float32)

    def lin_init(kw, kb, out_f, in_f, bias=True):
        # nn.Linear default init: U(-1/sqrt(in_features), 1/sqrt(in_features))
        bound = 1.0 / math.sqrt(in_f)
        w = jax.random.uniform(kw, (out_f, in_f), jnp.float32, -bound, bound)
        b = jax.random.uniform(kb, (out_f,), jnp.float32, -bound, bound) if bias else None
        return w, b

    wq, _ = lin_init(keys[1], keys[1], 1, 1, bias=False)
    wk, _ = lin_init(keys[2], keys[2], 1, 1, bias=False)
    wv, _ = lin_init(keys[3], keys[3], 1, 1, bias=False)
    w1, b1 = lin_init(keys[4], keys[5], H1, L)
    w2, b2 = lin_init(keys[6], keys[7], H2, H1)
    w3, b3 = lin_init(keys[8], keys[9], H3, H2)
    wp, bp = lin_init(keys[10], keys[11], O, H3)

    params = {"att": (wq, wk, wv),
              "mlp": ((w1, b1), (w2, b2), (w3, b3), (wp, bp))}

    out = jax.block_until_ready(net_forward(x, params))
    ref = net_forward_ref(x, params)

    assert out.shape == (B, O), out.shape
    max_err = float(jnp.max(jnp.abs(out - ref)))
    assert jnp.allclose(out, ref, atol=1e-4, rtol=1e-4), f"mismatch vs reference: {max_err}"
    print("KERNEL_OK")
</pallas_src>

<mosaic_0001>
module attributes {stable_mosaic.version = 11 : i64} {
  func.func @_net_kernel(%arg0: i32, %arg1: memref<2xf32, #tpu.memory_space<smem>>, %arg2: memref<8x16xf32, #tpu.memory_space<vmem>>, %arg3: memref<16x32xf32, #tpu.memory_space<vmem>>, %arg4: memref<1x32xf32, #tpu.memory_space<vmem>>, %arg5: memref<32x32xf32, #tpu.memory_space<vmem>>, %arg6: memref<1x32xf32, #tpu.memory_space<vmem>>, %arg7: memref<32x16xf32, #tpu.memory_space<vmem>>, %arg8: memref<1x16xf32, #tpu.memory_space<vmem>>, %arg9: memref<16x4xf32, #tpu.memory_space<vmem>>, %arg10: memref<1x4xf32, #tpu.memory_space<vmem>>, %arg11: memref<8x4xf32, #tpu.memory_space<vmem>>) attributes {dimension_semantics = [#tpu.dimension_semantics<parallel>], iteration_bounds = array<i64: 2>, scalar_prefetch = 0 : i64, scratch_operands = 0 : i64, tpu.core_type = #tpu.core_type<tc>, window_params = [{transform_indices = @transform_0, window_bounds = array<i64: 2>}, {transform_indices = @transform_1, window_bounds = array<i64: 8, 16>}, {pipeline_mode = #tpu.pipeline_mode<synchronous>, transform_indices = @transform_2, window_bounds = array<i64: 16, 32>}, {pipeline_mode = #tpu.pipeline_mode<synchronous>, transform_indices = @transform_3, window_bounds = array<i64: 1, 32>}, {pipeline_mode = #tpu.pipeline_mode<synchronous>, transform_indices = @transform_4, window_bounds = array<i64: 32, 32>}, {pipeline_mode = #tpu.pipeline_mode<synchronous>, transform_indices = @transform_5, window_bounds = array<i64: 1, 32>}, {pipeline_mode = #tpu.pipeline_mode<synchronous>, transform_indices = @transform_6, window_bounds = array<i64: 32, 16>}, {pipeline_mode = #tpu.pipeline_mode<synchronous>, transform_indices = @transform_7, window_bounds = array<i64: 1, 16>}, {pipeline_mode = #tpu.pipeline_mode<synchronous>, transform_indices = @transform_8, window_bounds = array<i64: 16, 4>}, {pipeline_mode = #tpu.pipeline_mode<synchronous>, transform_indices = @transform_9, window_bounds = array<i64: 1, 4>}, {transform_indices = @transform_10, window_bounds = array<i64: 8, 4>}]} {
    %c0 = arith.constant 0 : index
    %c0_0 = arith.constant 0 : index
    %0 = vector.load %arg2[%c0, %c0_0] : memref<8x16xf32, #tpu.memory_space<vmem>>, vector<8x16xf32>
    %c0_1 = arith.constant 0 : index
    %1 = memref.load %arg1[%c0_1] : memref<2xf32, #tpu.memory_space<smem>>
    %c1 = arith.constant 1 : index
    %2 = memref.load %arg1[%c1] : memref<2xf32, #tpu.memory_space<smem>>
    %3 = vector.broadcast %1 : f32 to vector<8x16xf32>
    %4 = arith.mulf %3, %0 : vector<8x16xf32>
    %5 = vector.shape_cast %4 : vector<8x16xf32> to vector<8x16x1xf32>
    %6 = vector.shape_cast %0 : vector<8x16xf32> to vector<8x1x16xf32>
    %7 = vector.broadcast %5 : vector<8x16x1xf32> to vector<8x16x16xf32>
    %8 = vector.broadcast %6 : vector<8x1x16xf32> to vector<8x16x16xf32>
    %9 = arith.mulf %7, %8 : vector<8x16x16xf32>
    %cst = arith.constant dense<0xFF800000> : vector<8x16xf32>
    %10 = vector.multi_reduction <maximumf>, %9, %cst [2] : vector<8x16x16xf32> to vector<8x16xf32>
    %11 = vector.shape_cast %10 : vector<8x16xf32> to vector<8x16x1xf32>
    %12 = vector.broadcast %11 : vector<8x16x1xf32> to vector<8x16x16xf32>
    %13 = arith.subf %9, %12 : vector<8x16x16xf32>
    %14 = math.exp %13 : vector<8x16x16xf32>
    %cst_2 = arith.constant dense<0.000000e+00> : vector<8x16xf32>
    %15 = vector.multi_reduction <add>, %14, %cst_2 [2] : vector<8x16x16xf32> to vector<8x16xf32>
    %16 = vector.shape_cast %0 : vector<8x16xf32> to vector<8x1x16xf32>
    %17 = vector.broadcast %16 : vector<8x1x16xf32> to vector<8x16x16xf32>
    %18 = arith.mulf %14, %17 : vector<8x16x16xf32>
    %cst_3 = arith.constant dense<0.000000e+00> : vector<8x16xf32>
    %19 = vector.multi_reduction <add>, %18, %cst_3 [2] : vector<8x16x16xf32> to vector<8x16xf32>
    %20 = tpu.reciprocal %15 {approx = true} : vector<8x16xf32> -> vector<8x16xf32>
    %21 = arith.mulf %15, %20 : vector<8x16xf32>
    %cst_4 = arith.constant 2.000000e+00 : f32
    %22 = vector.broadcast %cst_4 : f32 to vector<8x16xf32>
    %23 = arith.subf %22, %21 : vector<8x16xf32>
    %24 = arith.mulf %20, %23 : vector<8x16xf32>
    %25 = vector.broadcast %2 : f32 to vector<8x16xf32>
    %26 = arith.mulf %25, %19 : vector<8x16xf32>
    %27 = arith.mulf %26, %24 : vector<8x16xf32>
    %c0_5 = arith.constant 0 : index
    %c0_6 = arith.constant 0 : index
    %28 = vector.load %arg3[%c0_5, %c0_6] : memref<16x32xf32, #tpu.memory_space<vmem>>, vector<16x32xf32>
    %cst_7 = arith.constant dense<0.000000e+00> : vector<8x32xf32>
    %29 = tpu.matmul %27, %28, %cst_7 {dimension_numbers = #tpu.dot_dimension_numbers<[1], [0], [0], [1], [0, 0, 1, 1], [], []>} : vector<8x16xf32>, vector<16x32xf32>, vector<8x32xf32> -> vector<8x32xf32>
    %c0_8 = arith.constant 0 : index
    %c0_9 = arith.constant 0 : index
    %30 = vector.load %arg4[%c0_8, %c0_9] : memref<1x32xf32, #tpu.memory_space<vmem>>, vector<1x32xf32>
    %31 = vector.broadcast %30 : vector<1x32xf32> to vector<8x32xf32>
    %32 = arith.addf %29, %31 : vector<8x32xf32>
    %c0_10 = arith.constant 0 : index
    %c0_11 = arith.constant 0 : index
    %33 = vector.load %arg5[%c0_10, %c0_11] : memref<32x32xf32, #tpu.memory_space<vmem>>, vector<32x32xf32>
    %cst_12 = arith.constant dense<0.000000e+00> : vector<8x32xf32>
    %34 = tpu.matmul %32, %33, %cst_12 {dimension_numbers = #tpu.dot_dimension_numbers<[1], [0], [0], [1], [0, 0, 1, 1], [], []>} : vector<8x32xf32>, vector<32x32xf32>, vector<8x32xf32> -> vector<8x32xf32>
    %c0_13 = arith.constant 0 : index
    %c0_14 = arith.constant 0 : index
    %35 = vector.load %arg6[%c0_13, %c0_14] : memref<1x32xf32, #tpu.memory_space<vmem>>, vector<1x32xf32>
    %36 = vector.broadcast %35 : vector<1x32xf32> to vector<8x32xf32>
    %37 = arith.addf %34, %36 : vector<8x32xf32>
    %c0_15 = arith.constant 0 : index
    %c0_16 = arith.constant 0 : index
    %38 = vector.load %arg7[%c0_15, %c0_16] : memref<32x16xf32, #tpu.memory_space<vmem>>, vector<32x16xf32>
    %cst_17 = arith.constant dense<0.000000e+00> : vector<8x16xf32>
    %39 = tpu.matmul %37, %38, %cst_17 {dimension_numbers = #tpu.dot_dimension_numbers<[1], [0], [0], [1], [0, 0, 1, 1], [], []>} : vector<8x32xf32>, vector<32x16xf32>, vector<8x16xf32> -> vector<8x16xf32>
    %c0_18 = arith.constant 0 : index
    %c0_19 = arith.constant 0 : index
    %40 = vector.load %arg8[%c0_18, %c0_19] : memref<1x16xf32, #tpu.memory_space<vmem>>, vector<1x16xf32>
    %41 = vector.broadcast %40 : vector<1x16xf32> to vector<8x16xf32>
    %42 = arith.addf %39, %41 : vector<8x16xf32>
    %cst_20 = arith.constant 0.000000e+00 : f32
    %43 = vector.broadcast %cst_20 : f32 to vector<8x16xf32>
    %44 = arith.maximumf %42, %43 : vector<8x16xf32>
    %c0_21 = arith.constant 0 : index
    %c0_22 = arith.constant 0 : index
    %45 = vector.load %arg9[%c0_21, %c0_22] : memref<16x4xf32, #tpu.memory_space<vmem>>, vector<16x4xf32>
    %cst_23 = arith.constant dense<0.000000e+00> : vector<8x4xf32>
    %46 = tpu.matmul %44, %45, %cst_23 {dimension_numbers = #tpu.dot_dimension_numbers<[1], [0], [0], [1], [0, 0, 1, 1], [], []>} : vector<8x16xf32>, vector<16x4xf32>, vector<8x4xf32> -> vector<8x4xf32>
    %c0_24 = arith.constant 0 : index
    %c0_25 = arith.constant 0 : index
    %47 = vector.load %arg10[%c0_24, %c0_25] : memref<1x4xf32, #tpu.memory_space<vmem>>, vector<1x4xf32>
    %48 = vector.broadcast %47 : vector<1x4xf32> to vector<8x4xf32>
    %49 = arith.addf %46, %48 : vector<8x4xf32>
    %c0_26 = arith.constant 0 : index
    %c0_27 = arith.constant 0 : index
    %50 = vector.load %arg11[%c0_26, %c0_27] : memref<8x4xf32, #tpu.memory_space<vmem>>, vector<8x4xf32>
    tpu.vector_store %arg11[%c0_26, %c0_27], %49 {strides = array<i32>} : memref<8x4xf32, #tpu.memory_space<vmem>>, vector<8x4xf32>,
    return
  }
  func.func @transform_0(%arg0: i32) -> i32 {
    %c0_i32 = arith.constant 0 : i32
    %c0_i32_0 = arith.constant 0 : i32
    return %c0_i32 : i32
  }
  func.func @transform_1(%arg0: i32) -> (i32, i32) {
    %c0_i32 = arith.constant 0 : i32
    %c0_i32_0 = arith.constant 0 : i32
    return %arg0, %c0_i32 : i32, i32
  }
  func.func @transform_2(%arg0: i32) -> (i32, i32) {
    %c0_i32 = arith.constant 0 : i32
    %c0_i32_0 = arith.constant 0 : i32
    %c0_i32_1 = arith.constant 0 : i32
    return %c0_i32, %c0_i32_0 : i32, i32
  }
  func.func @transform_3(%arg0: i32) -> (i32, i32) {
    %c0_i32 = arith.constant 0 : i32
    %c0_i32_0 = arith.constant 0 : i32
    %c0_i32_1 = arith.constant 0 : i32
    return %c0_i32, %c0_i32_0 : i32, i32
  }
  func.func @transform_4(%arg0: i32) -> (i32, i32) {
    %c0_i32 = arith.constant 0 : i32
    %c0_i32_0 = arith.constant 0 : i32
    %c0_i32_1 = arith.constant 0 : i32
    return %c0_i32, %c0_i32_0 : i32, i32
  }
  func.func @transform_5(%arg0: i32) -> (i32, i32) {
    %c0_i32 = arith.constant 0 : i32
    %c0_i32_0 = arith.constant 0 : i32
    %c0_i32_1 = arith.constant 0 : i32
    return %c0_i32, %c0_i32_0 : i32, i32
  }
  func.func @transform_6(%arg0: i32) -> (i32, i32) {
    %c0_i32 = arith.constant 0 : i32
    %c0_i32_0 = arith.constant 0 : i32
    %c0_i32_1 = arith.constant 0 : i32
    return %c0_i32, %c0_i32_0 : i32, i32
  }
  func.func @transform_7(%arg0: i32) -> (i32, i32) {
    %c0_i32 = arith.constant 0 : i32
    %c0_i32_0 = arith.constant 0 : i32
    %c0_i32_1 = arith.constant 0 : i32
    return %c0_i32, %c0_i32_0 : i32, i32
  }
  func.func @transform_8(%arg0: i32) -> (i32, i32) {
    %c0_i32 = arith.constant 0 : i32
    %c0_i32_0 = arith.constant 0 : i32
    %c0_i32_1 = arith.constant 0 : i32
    return %c0_i32, %c0_i32_0 : i32, i32
  }
  func.func @transform_9(%arg0: i32) -> (i32, i32) {
    %c0_i32 = arith.constant 0 : i32
    %c0_i32_0 = arith.constant 0 : i32
    %c0_i32_1 = arith.constant 0 : i32
    return %c0_i32, %c0_i32_0 : i32, i32
  }
  func.func @transform_10(%arg0: i32) -> (i32, i32) {
    %c0_i32 = arith.constant 0 : i32
    %c0_i32_0 = arith.constant 0 : i32
    return %arg0, %c0_i32 : i32, i32
  }
}

</mosaic_0001>

<bundles_post_ra>
// kernel: tpu_custom_call.1
= control target key start
LH: loop header
LB: loop body
LE: loop exit
PB: predicated region body
PF: predicated region fallthrough
CT: control target
= control target key end

     0   :  { %15 = vsyncpa [#allocation4], 0  ;;  %s1758_s0 = inlined_call_operand.vmem [shape: f32[2], index: 0, kind: input, shape index: {}]   ;;  %s1759_s1 = inlined_call_operand.vmem [shape: f32[16,16], index: 1, kind: input, shape index: {}]   ;;  %s1760_s2 = inlined_call_operand.hbm [shape: f32[16,32], index: 2, kind: input, shape index: {}]   ;;  %s1761_s3 = inlined_call_operand.vmem [shape: f32[1,32], index: 3, kind: input, shape index: {}]   ;;  %s1762_s4 = inlined_call_operand.vmem [shape: f32[32,32], index: 4, kind: input, shape index: {}]   ;;  %s1763_s5 = inlined_call_operand.vmem [shape: f32[1,32], index: 5, kind: input, shape index: {}]   ;;  %s1764_s6 = inlined_call_operand.vmem [shape: f32[32,16], index: 6, kind: input, shape index: {}]   ;;  %s1765_s7 = inlined_call_operand.vmem [shape: f32[1,16], index: 7, kind: input, shape index: {}]   ;;  %s1766_s8 = inlined_call_operand.vmem [shape: f32[16,4], index: 8, kind: input, shape index: {}]   ;;  %s1767_s9 = inlined_call_operand.vmem [shape: f32[1,4], index: 9, kind: input, shape index: {}]   ;;  %s1768_s10 = inlined_call_operand.vmem [shape: f32[16,4], index: 10, kind: output, shape index: {}]  }
   0x1   :  { %16 = vsyncpa [#allocation3], 0  ;;  %s1347_s13 = smov 0  }
   0x2 LB: > { %s280_s16 = sshll.u32 %s1758_s0, 4  ;;  %s1099_s17 = sadd.s32 4294967295, %s1286_s13   ;;  %s1286_s13 = sphi %s1347_s13, %s22_s13   ;;  %s281_s16 = int_to_ptr.vmem [resolvable:$true] %s280_s16 }
   0x3   : > { %p1101_p0 = scmp.ge.s32.totalorder %s1286_s13, 1  ;;  %p268_p1 = scmp.lt.s32.totalorder %s1286_s13, 3 }
   0x4   : > { %p1132_p2 = scmp.eq.s32.totalorder %s1099_s17, 0  ;;  %s289_s21 = sshll.u32 %s1760_s2, 4  ;;  %s290_s21 = int_to_ptr.hbm [resolvable:$true] %s289_s21 }
   0x5   : > { %p1358_p3 = pnand %p1101_p0, %p268_p1  ;;  %s1288_s22 = smov [#allocation5]  }
   0x6   : > { %s291_s23 = sshll.u32 %s1288_s22, 4  ;;  %s1289_s24 = smov [#allocation2]   ;;  %s292_s23 = int_to_ptr.vmem [resolvable:$true] %s291_s23 }
   0x7   : > { %p1125_p4 = pneg %p1358_p3  ;;  %s1290_s25 = smov 128  }
   0x8   : > { %s1291_s26 = smov 8   ;;  %335 = sbr.rel (%p1358_p3) target bundleno = 1072 (0x430), region = 60 }
   0x9   : > { %p1126_p5 = pnand %p1132_p2, %p1125_p4 }
   0xb   : > { %1128 = dma.vmem_to_smem (!%p1126_p5), %s281_s16, 16, %s1289_s24, [#allocation4]  }
   0xc   : > { %1131 = dma.hbm_to_vmem [thread:$0]  (!%p1126_p5), %s290_s21, 256, %s292_s23, [#allocation3], %s1290_s25, %s1290_s25, %s1291_s26  }
   0xd   : > { %1277 = dma.done.wait (%p1132_p2), [#allocation4], 16  }
   0xe   : > { %1279 = vsyncadd (%p1132_p2), [#allocation4], 4294967280 }
   0xf   : > { %1281 = dma.done.wait (%p1132_p2), [#allocation3], 256  }
  0x10   : > { %1283 = vsyncadd (%p1132_p2), [#allocation3], 4294967040 }
  0x11   : > { %347 = sfence }
  0x12   : > { %v392_v0 = vlaneseq  ;;  %p378_p6 = scmp.lt.s32.totalorder %s1099_s17, 1  ;;  %s387_s27 = sld [smem:[#allocation2]]  ;;  %vm535_vm0 = vcmask 130048   ;;  %vm868_vm1 = vcmask 130112   ;;  %vm891_vm2 = vcmask 1041409  }
  0x13   : > { %s1110_s12 = sld [smem:[#allocation2 + $0x1]]  ;;  %vm893_vm3 = vcmask 1042434   ;;  %vm895_vm4 = vcmask 1043459   ;;  %vm897_vm5 = vcmask 1044484   ;;  %vm899_vm6 = vcmask 1045509  }
  0x14   : > { %v393_v1 = vshrl.u32 %v392_v0, 7  ;;  %s1771_s17 = smov (!%p378_p6, %s1099_s17), 1  ;;  %vm901_vm7 = vcmask 1046534   ;;  %vm903_vm8 = vcmask 1047559   ;;  %vm935_vm9 = vcmask 261120  }
  0x15   : > { %s1108_s28 = sshll.u32 %s1771_s17, 3  ;;  %vm1020_vm10 = vcmask 31744  }
  0x16   : > { %1150 = vset.pattern.permute.xlu2 %v393_v1  ;;  %1149 = vset.pattern.permute.xlu1 %v393_v1  ;;  %s381_s11 = scalar_lea.vmem %s1759_s1, %s1108_s28  ;;  %v400_v8 = vadd.s32 8, %v393_v1  ;;  %s385_s29 = scalar_lea.vmem %s1768_s10, %s1108_s28 }
  0x17   : > { %1148 = vset.pattern.permute.xlu0 %v393_v1  ;;  %v1383_v2 = vld [vmem:[%s381_s11] sm:$0xff] }
  0x18   : > { %v389_v3 = vstv %s387_s27  ;;  %v496_v15 = vrot.slane %v1383_v2, 1  ;;  %v497_v18 = vrot.slane %v1383_v2, 2  ;;  %v1393_v19 = vperm.slane %v1383_v2, 0 }
  0x19   : > { %v390_v4 = vmul.f32 %v389_v3, %v1383_v2  ;;  %v499_v25 = vrot.slane %v1383_v2, 4  ;;  %v500_v32 = vrot.slane %v1383_v2, 5  ;;  %v498_v37 = vrot.slane %v1383_v2, 3 }
  0x1a   : > { %v1389_v17 = vperm.slane %v496_v15, 0  ;;  %v1398_v23 = vperm.slane %v497_v18, 0  ;;  %v501_v46 = vrot.slane %v1383_v2, 6  ;;  %v502_v57 = vrot.slane %v1383_v2, 7 }
  0x1b   : > { %v417_v5 = vperm.slane %v390_v4, 2  ;;  %v404_v6 = vperm.slane %v390_v4, 1  ;;  %v391_v7 = vperm.slane %v390_v4, 0  ;;  %v443_v9 = vperm.slane %v390_v4, 4 }
  0x1c   : > { %v430_v10 = vperm.slane %v390_v4, 3  ;;  %v469_v11 = vperm.slane %v390_v4, 6  ;;  %v456_v12 = vperm.slane %v390_v4, 5  ;;  %v482_v13 = vperm.slane %v390_v4, 7 }
  0x1d   : > { %v1411_v30 = vperm.slane %v499_v25, 0  ;;  %v1421_v36 = vperm.slane %v500_v32, 0  ;;  %v1427_v40 = vperm.slane %v498_v37, 0  ;;  %v1437_v47 = vperm.slane %v501_v46, 0 }
  0x1e   : > { %422 = vperm.xlu2 %1150, %v417_v5   ;;  %409 = vperm.xlu1 %1149, %v404_v6   ;;  %v1458_v60 = vperm.slane %v502_v57, 0 }
  0x1f   : > { %396 = vperm.xlu0 %1148, %v391_v7  }
  0x26   : > { %1153 = vset.pattern.permute.xlu2 %v400_v8  ;;  %1151 = vset.pattern.permute.xlu1 %v400_v8 }
  0x27   : > { %448 = vperm.xlu0 %1148, %v443_v9  }
  0x2e   : > { %428 = vperm.xlu2 %1153, %v417_v5   ;;  %415 = vperm.xlu1 %1151, %v404_v6  }
  0x2f   : > { %1154 = vset.pattern.permute.xlu0 %v400_v8 }
  0x36   : > { %441 = vperm.xlu2 %1153, %v430_v10   ;;  %1152 = vset.pattern.permute.xlu1 %v393_v1 }
  0x37   : > { %402 = vperm.xlu0 %1154, %v391_v7  }
  0x3e   : > { %1156 = vset.pattern.permute.xlu2 %v393_v1  ;;  %435 = vperm.xlu1 %1152, %v430_v10  }
  0x3f   : > { %480 = vperm.xlu0 %1154, %v469_v11  }
  0x46   : > { %461 = vperm.xlu2 %1156, %v456_v12   ;;  %1155 = vset.pattern.permute.xlu1 %v400_v8 }
  0x4e   : > { %454 = vperm.xlu1 %1155, %v443_v9   ;;  %474 = vperm.xlu2 %1156, %v469_v11  }
  0x56   : > { %467 = vperm.xlu1 %1155, %v456_v12   ;;  %1158 = vset.pattern.permute.xlu2 %v400_v8 }
  0x5e   : > { %1157 = vset.pattern.permute.xlu1 %v393_v1  ;;  %493 = vperm.xlu2 %1158, %v482_v13  }
  0x66   : > { %487 = vperm.xlu1 %1157, %v482_v13  }
  0x78   : > { %v423_v14 = vpop.permute.xlu2 %422 }
  0x79   : > { %v1409_v28 = vmul.f32 %v1398_v23, %v423_v14 }
  0x7b   : > { %v548_v34 = vsel %vm535_vm0, %v1409_v28, -inf }
  0x88   : > { %v1387_v16 = vpop.permute.xlu2 %428 }
  0x89   : > { %v1484_v10 = vmul.f32 %v1398_v23, %v1387_v16 }
  0x8b   : > { %v551_v11 = vsel %vm535_vm0, %v1484_v10, -inf }
  0x90   : > { %v410_v20 = vpop.permute.xlu1 %409  ;;  %v442_v29 = vpop.permute.xlu2 %441 }
  0x91   : > { %v1396_v21 = vmul.f32 %v1389_v17, %v410_v20  ;;  %v397_v22 = vpop.permute.xlu0 %396  ;;  %v1432_v42 = vmul.f32 %v1427_v40, %v442_v29 }
  0x92   : > { %v1401_v24 = vmul.f32 %v1393_v19, %v397_v22 }
  0x93   : > { %v542_v26 = vsel %vm535_vm0, %v1396_v21, -inf  ;;  %v557_v45 = vsel %vm535_vm0, %v1432_v42, -inf }
  0x94   : > { %543 = vmax.xlane.f32.xlu0 %v542_v26  ;;  %v536_v27 = vsel %vm535_vm0, %v1401_v24, -inf }
  0x95   : > { %537 = vmax.xlane.f32.xlu1 %v536_v27 }
  0x99   : > { %v449_v31 = vpop.permute.xlu0 %448 }
  0x9a   : > { %v1415_v33 = vmul.f32 %v1411_v30, %v449_v31 }
  0x9c   : > { %v560_v35 = vsel %vm535_vm0, %v1415_v33, -inf }
  0x9d   : > { %549 = vmax.xlane.f32.xlu1 %v548_v34  ;;  %561 = vmax.xlane.f32.xlu2 %v560_v35 }
  0xa0   : > { %v462_v38 = vpop.permute.xlu2 %461  ;;  %v416_v43 = vpop.permute.xlu1 %415 }
  0xa1   : > { %v1425_v39 = vmul.f32 %v1421_v36, %v462_v38  ;;  %v1478_v8 = vmul.f32 %v1389_v17, %v416_v43 }
  0xa3   : > { %v566_v41 = vsel %vm535_vm0, %v1425_v39, -inf  ;;  %v545_v9 = vsel %vm535_vm0, %v1478_v8, -inf }
  0xa5   : > { %567 = vmax.xlane.f32.xlu1 %v566_v41 }
  0xa8   : > { %v475_v52 = vpop.permute.xlu2 %474 }
  0xa9   : > { %v403_v44 = vpop.permute.xlu0 %402  ;;  %v1450_v55 = vmul.f32 %v1437_v47, %v475_v52 }
  0xaa   : > { %v1473_v6 = vmul.f32 %v1393_v19, %v403_v44 }
  0xab   : > { %v572_v56 = vsel %vm535_vm0, %v1450_v55, -inf }
  0xac   : > { %v539_v7 = vsel %vm535_vm0, %v1473_v6, -inf }
  0xad   : > { %558 = vmax.xlane.f32.xlu1 %v557_v45 }
  0xb0   : > { %v436_v48 = vpop.permute.xlu1 %435 }
  0xb1   : > { %v1440_v49 = vmul.f32 %v1427_v40, %v436_v48  ;;  %v481_v50 = vpop.permute.xlu0 %480 }
  0xb2   : > { %v1443_v51 = vmul.f32 %v1437_v47, %v481_v50 }
  0xb3   : > { %v554_v53 = vsel %vm535_vm0, %v1440_v49, -inf }
  0xb4   : > { %555 = vmax.xlane.f32.xlu0 %v554_v53  ;;  %v575_v54 = vsel %vm535_vm0, %v1443_v51, -inf }
  0xb5   : > { %576 = vmax.xlane.f32.xlu1 %v575_v54 }
  0xb8   : > { %v494_v61 = vpop.permute.xlu2 %493 }
  0xb9   : > { %v1463_v63 = vmul.f32 %v1458_v60, %v494_v61 }
  0xbb   : > { %v581_v1 = vsel %vm535_vm0, %v1463_v63, -inf }
  0xbc   : > { %573 = vmax.xlane.f32.xlu0 %v572_v56 }
  0xc0   : > { %v455_v58 = vpop.permute.xlu1 %454 }
  0xc1   : > { %v1456_v59 = vmul.f32 %v1411_v30, %v455_v58 }
  0xc3   : > { %v563_v62 = vsel %vm535_vm0, %v1456_v59, -inf }
  0xc4   : > { %564 = vmax.xlane.f32.xlu0 %v563_v62 }
  0xc8   : > { %v468_v3 = vpop.permute.xlu1 %467 }
  0xc9   : > { %v1489_v12 = vmul.f32 %v1421_v36, %v468_v3 }
  0xcb   : > { %v569_v13 = vsel %vm535_vm0, %v1489_v12, -inf }
  0xcc   : > { %582 = vmax.xlane.f32.xlu0 %v581_v1 }
  0xd8   : > { %v488_v2 = vpop.permute.xlu1 %487 }
  0xd9   : > { %v1468_v4 = vmul.f32 %v1458_v60, %v488_v2 }
  0xdb   : > { %v578_v5 = vsel %vm535_vm0, %v1468_v4, -inf }
  0xdc   : > { %579 = vmax.xlane.f32.xlu2 %v578_v5 }
  0xe4   : > { %540 = vmax.xlane.f32.xlu2 %v539_v7 }
  0xec   : > { %546 = vmax.xlane.f32.xlu2 %v545_v9 }
  0xf4   : > { %552 = vmax.xlane.f32.xlu2 %v551_v11 }
  0xfc   : > { %570 = vmax.xlane.f32.xlu2 %v569_v13 }
 0x107   : > { %v544_v14 = vpop.xlane.xlu0 %543 }
 0x108   : > { %v538_v15 = vpop.xlane.xlu1 %537  ;;  %v586_v18 = vsub.f32 %v1396_v21, %v544_v14 }
 0x109   : > { %v584_v20 = vsub.f32 %v1401_v24, %v538_v15 }
 0x10a   : > { %v604_v22 = vmul.f32 1.442695, %v586_v18 }
 0x10b   : > { %v600_v16 = vmul.f32 1.442695, %v584_v20 }
 0x10c   : > { %1163 = vpow2.f32 %v604_v22 }
 0x10d   : > { %1165 = vpow2.f32 %v600_v16 }
 0x110   : > { %v550_v25 = vpop.xlane.xlu1 %549  ;;  %v562_v26 = vpop.xlane.xlu2 %561 }
 0x111   : > { %v588_v27 = vsub.f32 %v1409_v28, %v550_v25  ;;  %v592_v29 = vsub.f32 %v1415_v33, %v562_v26 }
 0x112   : > { %v1497_v31 = vpop.eup %1163 }
 0x113   : > { %v1499_v32 = vpop.eup %1165  ;;  %v608_v34 = vmul.f32 1.442695, %v588_v27  ;;  %v616_v35 = vmul.f32 1.442695, %v592_v29  ;;  %v638_v21 = vsel %vm535_vm0, %v1497_v31, 0.0 }
 0x114   : > { %v632_v24 = vsel %vm535_vm0, %v1499_v32, 0.0  ;;  %639 = vadd.xlane.f32.xlu0 %v638_v21 }
 0x115   : > { %1167 = vpow2.f32 %v608_v34  ;;  %633 = vadd.xlane.f32.xlu1 %v632_v24 }
 0x116   : > { %1169 = vpow2.f32 %v616_v35 }
 0x118   : > { %v568_v37 = vpop.xlane.xlu1 %567 }
 0x119   : > { %v594_v28 = vsub.f32 %v1425_v39, %v568_v37 }
 0x11b   : > { %v1506_v33 = vpop.eup %1167  ;;  %v620_v38 = vmul.f32 1.442695, %v594_v28 }
 0x11c   : > { %v1508_v41 = vpop.eup %1169  ;;  %v644_v43 = vsel %vm535_vm0, %v1506_v33, 0.0 }
 0x11d   : > { %1171 = vpow2.f32 %v620_v38  ;;  %645 = vadd.xlane.f32.xlu2 %v644_v43  ;;  %v656_v44 = vsel %vm535_vm0, %v1508_v41, 0.0 }
 0x11e   : > { %657 = vadd.xlane.f32.xlu0 %v656_v44 }
 0x123   : > { %v1514_v45 = vpop.eup %1171 }
 0x124   : > { %v662_v46 = vsel %vm535_vm0, %v1514_v45, 0.0 }
 0x125   : > { %663 = vadd.xlane.f32.xlu2 %v662_v46 }
 0x127   : > { %v556_v39 = vpop.xlane.xlu0 %555 }
 0x128   : > { %v590_v48 = vsub.f32 %v1440_v49, %v556_v39 }
 0x12a   : > { %v612_v50 = vmul.f32 1.442695, %v590_v48 }
 0x12c   : > { %1173 = vpow2.f32 %v612_v50  ;;  %v680_v50 = vmul.f32 %v1499_v32, %v1393_v19  ;;  %v682_v32 = vmul.f32 %v1497_v31, %v1389_v17 }
 0x12f   : > { %v574_v52 = vpop.xlane.xlu0 %573 }
 0x130   : > { %v596_v53 = vsub.f32 %v1450_v55, %v574_v52  ;;  %v559_v55 = vpop.xlane.xlu1 %558 }
 0x131   : > { %v591_v7 = vsub.f32 %v1432_v42, %v559_v55  ;;  %v702_v55 = vsel %vm535_vm0, %v682_v32, 0.0 }
 0x132   : > { %v1520_v54 = vpop.eup %1173  ;;  %v624_v56 = vmul.f32 1.442695, %v596_v53 }
 0x133   : > { %v650_v57 = vsel %vm535_vm0, %v1520_v54, 0.0  ;;  %v614_v13 = vmul.f32 1.442695, %v591_v7 }
 0x134   : > { %1175 = vpow2.f32 %v624_v56  ;;  %651 = vadd.xlane.f32.xlu1 %v650_v57 }
 0x137   : > { %v565_v14 = vpop.xlane.xlu0 %564 }
 0x138   : > { %v577_v15 = vpop.xlane.xlu1 %576  ;;  %v593_v42 = vsub.f32 %v1456_v59, %v565_v14 }
 0x13a   : > { %v1524_v58 = vpop.eup %1175  ;;  %v618_v26 = vmul.f32 1.442695, %v593_v42 }
 0x13b   : > { %v668_v61 = vsel %vm535_vm0, %v1524_v58, 0.0 }
 0x13c   : > { %669 = vadd.xlane.f32.xlu1 %v668_v61  ;;  %v684_v61 = vmul.f32 %v1506_v33, %v1398_v23  ;;  %v692_v33 = vmul.f32 %v1524_v58, %v1437_v47 }
 0x13f   : > { %v583_v34 = vpop.xlane.xlu0 %582 }
 0x14f   : > { %v580_v49 = vpop.xlane.xlu2 %579 }
 0x150   : > { %v598_v62 = vsub.f32 %v1468_v4, %v580_v49  ;;  %v686_v49 = vmul.f32 %v1520_v54, %v1427_v40  ;;  %v688_v54 = vmul.f32 %v1508_v41, %v1411_v30 }
 0x152   : > { %v628_v1 = vmul.f32 1.442695, %v598_v62  ;;  %v708_v62 = vsel %vm535_vm0, %v684_v61, 0.0  ;;  %v720_v7 = vsel %vm535_vm0, %v688_v54, 0.0 }
 0x154   : > { %1177 = vpow2.f32 %v628_v1  ;;  %v714_v1 = vsel %vm535_vm0, %v686_v49, 0.0 }
 0x157   : > { %v541_v3 = vpop.xlane.xlu2 %540 }
 0x158   : > { %v585_v2 = vsub.f32 %v1473_v6, %v541_v3  ;;  %v597_v6 = vsub.f32 %v1443_v51, %v577_v15  ;;  %v599_v51 = vsub.f32 %v1463_v63, %v583_v34  ;;  %v690_v3 = vmul.f32 %v1514_v45, %v1421_v36 }
 0x15a   : > { %v1530_v5 = vpop.eup %1177  ;;  %v602_v9 = vmul.f32 1.442695, %v585_v2  ;;  %v626_v25 = vmul.f32 1.442695, %v597_v6  ;;  %v630_v37 = vmul.f32 1.442695, %v599_v51 }
 0x15b   : > { %v674_v11 = vsel %vm535_vm0, %v1530_v5, 0.0  ;;  %v726_v31 = vsel %vm535_vm0, %v690_v3, 0.0  ;;  %v732_v2 = vsel %vm535_vm0, %v692_v33, 0.0 }
 0x15c   : > { %1179 = vpow2.f32 %v602_v9  ;;  %675 = vadd.xlane.f32.xlu0 %v674_v11 }
 0x15d   : > { %1181 = vpow2.f32 %v614_v13 }
 0x15f   : > { %v547_v4 = vpop.xlane.xlu2 %546 }
 0x160   : > { %v587_v18 = vsub.f32 %v1478_v8, %v547_v4 }
 0x162   : > { %v1536_v20 = vpop.eup %1179  ;;  %v606_v22 = vmul.f32 1.442695, %v587_v18 }
 0x163   : > { %v635_v16 = vsel %vm535_vm0, %v1536_v20, 0.0  ;;  %v1542_v29 = vpop.eup %1181  ;;  %v681_v9 = vmul.f32 %v1536_v20, %v1393_v19 }
 0x164   : > { %1183 = vpow2.f32 %v606_v22  ;;  %636 = vadd.xlane.f32.xlu2 %v635_v16  ;;  %v653_v59 = vsel %vm535_vm0, %v1542_v29, 0.0  ;;  %v687_v14 = vmul.f32 %v1542_v29, %v1427_v40  ;;  %v694_v40 = vmul.f32 %v1530_v5, %v1458_v60 }
 0x165   : > { %1185 = vpow2.f32 %v626_v25  ;;  %v699_v58 = vsel %vm535_vm0, %v681_v9, 0.0 }
 0x166   : > { %1187 = vpow2.f32 %v618_v26  ;;  %v738_v6 = vsel %vm535_vm0, %v694_v40, 0.0 }
 0x167   : > { %v553_v27 = vpop.xlane.xlu2 %552 }
 0x168   : > { %v589_v8 = vsub.f32 %v1484_v10, %v553_v27 }
 0x16a   : > { %v1184_v35 = vpop.eup %1183  ;;  %v610_v21 = vmul.f32 1.442695, %v589_v8 }
 0x16b   : > { %v641_v24 = vsel %vm535_vm0, %v1184_v35, 0.0  ;;  %v1186_v38 = vpop.eup %1185  ;;  %v683_v45 = vmul.f32 %v1184_v35, %v1389_v17  ;;  %v717_v17 = vsel %vm535_vm0, %v687_v14, 0.0 }
 0x16c   : > { %1189 = vpow2.f32 %v610_v21  ;;  %654 = vadd.xlane.f32.xlu2 %v653_v59  ;;  %642 = vadd.xlane.f32.xlu1 %v641_v24  ;;  %v1188_v10 = vpop.eup %1187  ;;  %v671_v39 = vsel %vm535_vm0, %v1186_v38, 0.0  ;;  %v693_v18 = vmul.f32 %v1186_v38, %v1437_v47  ;;  %v1609_v38 = vstv %s1110_s12 }
 0x16d   : > { %1191 = vpow2.f32 %v630_v37  ;;  %v659_v48 = vsel %vm535_vm0, %v1188_v10, 0.0  ;;  %v705_v41 = vsel %vm535_vm0, %v683_v45, 0.0  ;;  %v689_v15 = vmul.f32 %v1188_v10, %v1411_v30 }
 0x16e   : > { %v735_v30 = vsel %vm535_vm0, %v693_v18, 0.0 }
 0x16f   : > { %v571_v28 = vpop.xlane.xlu2 %570 }
 0x170   : > { %v595_v43 = vsub.f32 %v1489_v12, %v571_v28  ;;  %v696_v12 = vsel %vm535_vm0, %v680_v50, 0.0 }
 0x172   : > { %v1190_v44 = vpop.eup %1189  ;;  %v622_v46 = vmul.f32 1.442695, %v595_v43 }
 0x173   : > { %v647_v63 = vsel %vm535_vm0, %v1190_v44, 0.0  ;;  %v1192_v52 = vpop.eup %1191  ;;  %v685_v11 = vmul.f32 %v1190_v44, %v1398_v23  ;;  %v723_v23 = vsel %vm535_vm0, %v689_v15, 0.0 }
 0x174   : > { %1193 = vpow2.f32 %v622_v46  ;;  %672 = vadd.xlane.f32.xlu2 %v671_v39  ;;  %648 = vadd.xlane.f32.xlu0 %v647_v63  ;;  %v677_v57 = vsel %vm535_vm0, %v1192_v52, 0.0  ;;  %v695_v20 = vmul.f32 %v1192_v52, %v1458_v60  ;;  %v1614_v46 = vand.u32 127, %v392_v0 }
 0x175   : > { %660 = vadd.xlane.f32.xlu1 %v659_v48  ;;  %v711_v13 = vsel %vm535_vm0, %v685_v11, 0.0 }
 0x17a   : > { %v1194_v53 = vpop.eup %1193 }
 0x17b   : > { %v665_v56 = vsel %vm535_vm0, %v1194_v53, 0.0  ;;  %v691_v19 = vmul.f32 %v1194_v53, %v1421_v36  ;;  %v741_v36 = vsel %vm535_vm0, %v695_v20, 0.0 }
 0x17c   : > { %697 = vadd.xlane.f32.xlu2 %v696_v12  ;;  %666 = vadd.xlane.f32.xlu0 %v665_v56 }
 0x17d   : > { %678 = vadd.xlane.f32.xlu1 %v677_v57  ;;  %v729_v4 = vsel %vm535_vm0, %v691_v19, 0.0 }
 0x184   : > { %709 = vadd.xlane.f32.xlu0 %v708_v62  ;;  %715 = vadd.xlane.f32.xlu2 %v714_v1 }
 0x185   : > { %703 = vadd.xlane.f32.xlu1 %v702_v55 }
 0x187   : > { %v640_v16 = vpop.xlane.xlu0 %639 }
 0x188   : > { %v634_v22 = vpop.xlane.xlu1 %633 }
 0x189   : > { %1195 = vrcp.f32 %v634_v22 }
 0x18c   : > { %727 = vadd.xlane.f32.xlu0 %v726_v31  ;;  %733 = vadd.xlane.f32.xlu2 %v732_v2 }
 0x18d   : > { %721 = vadd.xlane.f32.xlu1 %v720_v7 }
 0x18f   : > { %v1196_v8 = vpop.eup %1195 }
 0x190   : > { %v646_v42 = vpop.xlane.xlu2 %645  ;;  %v760_v51 = vmul.f32 %v1196_v8, %v634_v22 }
 0x191   : > { %v1597_v47 = vpop.xlane.xlu0 %657  ;;  %1197 = vrcp.f32 %v646_v42 }
 0x192   : > { %v776_v37 = vsub.f32 2.0, %v760_v51 }
 0x194   : > { %700 = vadd.xlane.f32.xlu0 %v699_v58  ;;  %706 = vadd.xlane.f32.xlu2 %v705_v41  ;;  %v792_v39 = vmul.f32 %v1196_v8, %v776_v37  ;;  %v842_v58 = vld [vmem:[#allocation5 + $0x8] sm:$0xff]  ;;  %v841_v41 = vld [vmem:[#allocation5] sm:$0xff] }
 0x195   : > { %712 = vadd.xlane.f32.xlu1 %v711_v13  ;;  %921 = vmatpush.msra.mxu0 %v842_v58 }
 0x197   : > { %v1198_v24 = vpop.eup %1197  ;;  %922 = vmatpush.msra.mxu0 %v841_v41 }
 0x198   : > { %v664_v26 = vpop.xlane.xlu2 %663  ;;  %v764_v43 = vmul.f32 %v1198_v24, %v646_v42 }
 0x19a   : > { %v780_v53 = vsub.f32 2.0, %v764_v43 }
 0x19c   : > { %718 = vadd.xlane.f32.xlu0 %v717_v17  ;;  %724 = vadd.xlane.f32.xlu2 %v723_v23  ;;  %v796_v61 = vmul.f32 %v1198_v24, %v780_v53 }
 0x19d   : > { %730 = vadd.xlane.f32.xlu1 %v729_v4 }
 0x1a4   : > { %736 = vadd.xlane.f32.xlu0 %v735_v30  ;;  %742 = vadd.xlane.f32.xlu2 %v741_v36  ;;  %v930_v36 = vld [vmem:[%s1762_s4 + $0x18] sm:$0xff] }
 0x1a5   : > { %739 = vadd.xlane.f32.xlu1 %v738_v6  ;;  %v929_v6 = vld [vmem:[%s1762_s4 + $0x10] sm:$0xff]  ;;  %951 = vmatpush.msra.mxu1 %v930_v36 }
 0x1a7   : > { %v652_v25 = vpop.xlane.xlu1 %651  ;;  %952 = vmatpush.msra.mxu1 %v929_v6 }
 0x1a8   : > { %1199 = vrcp.f32 %v652_v25 }
 0x1a9   : > { %1201 = vrcp.f32 %v664_v26 }
 0x1aa   : > { %1203 = vrcp.f32 %v640_v16 }
 0x1ae   : > { %v1200_v28 = vpop.eup %1199 }
 0x1af   : > { %v1599_v27 = vpop.xlane.xlu1 %669  ;;  %v766_v63 = vmul.f32 %v1200_v28, %v652_v25  ;;  %v1202_v12 = vpop.eup %1201 }
 0x1b0   : > { %v770_v49 = vmul.f32 %v1202_v12, %v664_v26  ;;  %v1204_v31 = vpop.eup %1203 }
 0x1b1   : > { %v782_v56 = vsub.f32 2.0, %v766_v63  ;;  %v762_v14 = vmul.f32 %v1204_v31, %v640_v16 }
 0x1b2   : > { %v786_v7 = vsub.f32 2.0, %v770_v49 }
 0x1b3   : > { %v798_v62 = vmul.f32 %v1200_v28, %v782_v56  ;;  %v778_v22 = vsub.f32 2.0, %v762_v14 }
 0x1b4   : > { %v802_v4 = vmul.f32 %v1202_v12, %v786_v7 }
 0x1cf   : > { %v1601_v60 = vpop.xlane.xlu0 %675 }
 0x1d7   : > { %v637_v29 = vpop.xlane.xlu2 %636 }
 0x1d8   : > { %1205 = vrcp.f32 %v637_v29 }
 0x1de   : > { %v1206_v2 = vpop.eup %1205 }
 0x1df   : > { %v1603_v5 = vpop.xlane.xlu2 %654  ;;  %v643_v34 = vpop.xlane.xlu1 %642  ;;  %v761_v19 = vmul.f32 %v1206_v2, %v637_v29 }
 0x1e0   : > { %1207 = vrcp.f32 %v643_v34 }
 0x1e1   : > { %v777_v26 = vsub.f32 2.0, %v761_v19 }
 0x1e3   : > { %v793_v43 = vmul.f32 %v1206_v2, %v777_v26 }
 0x1e6   : > { %v1208_v11 = vpop.eup %1207 }
 0x1e7   : > { %v1605_v35 = vpop.xlane.xlu2 %672  ;;  %v649_v21 = vpop.xlane.xlu0 %648  ;;  %v763_v18 = vmul.f32 %v1208_v11, %v643_v34 }
 0x1e8   : > { %v1607_v59 = vpop.xlane.xlu1 %660  ;;  %1209 = vrcp.f32 %v649_v21 }
 0x1e9   : > { %1211 = vrcp.f32 %v1597_v47  ;;  %v779_v34 = vsub.f32 2.0, %v763_v18 }
 0x1ea   : > { %1213 = vrcp.f32 %v1603_v5 }
 0x1eb   : > { %1215 = vrcp.f32 %v1607_v59  ;;  %v795_v53 = vmul.f32 %v1208_v11, %v779_v34 }
 0x1ee   : > { %v1210_v13 = vpop.eup %1209 }
 0x1ef   : > { %v698_v10 = vpop.xlane.xlu2 %697  ;;  %v1611_v44 = vpop.xlane.xlu0 %666  ;;  %v765_v30 = vmul.f32 %v1210_v13, %v649_v21 }
 0x1f0   : > { %v809_v48 = vmul.f32 %v1609_v38, %v698_v10  ;;  %v1617_v50 = vpop.xlane.xlu1 %678  ;;  %v1212_v15 = vpop.eup %1211  ;;  %1217 = vrcp.f32 %v1611_v44 }
 0x1f1   : > { %v768_v42 = vmul.f32 %v1212_v15, %v1597_v47  ;;  %v1214_v25 = vpop.eup %1213  ;;  %1219 = vrcp.f32 %v1599_v27  ;;  %v781_v51 = vsub.f32 2.0, %v765_v30  ;;  %v794_v47 = vmul.f32 %v1204_v31, %v778_v22 }
 0x1f2   : > { %v1619_v52 = vmul.f32 %v809_v48, %v792_v39  ;;  %v1216_v29 = vpop.eup %1215  ;;  %1221 = vrcp.f32 %v1605_v35  ;;  %v767_v28 = vmul.f32 %v1214_v25, %v1603_v5  ;;  %v1659_v39 = vadd.s32 4294967288, %v1614_v46 }
 0x1f3   : > { %v784_v37 = vsub.f32 2.0, %v768_v42  ;;  %1223 = vrcp.f32 %v1617_v50  ;;  %v769_v10 = vmul.f32 %v1216_v29, %v1607_v59  ;;  %v797_v5 = vmul.f32 %v1210_v13, %v781_v51 }
 0x1f4   : > { %v865_v57 = vperm.slane %v1619_v52, %v1614_v46  ;;  %1225 = vrcp.f32 %v1601_v60  ;;  %v783_v59 = vsub.f32 2.0, %v767_v28 }
 0x1f5   : > { %v785_v2 = vsub.f32 2.0, %v769_v10 }
 0x1f6   : > { %v1218_v24 = vpop.eup %1217 }
 0x1f7   : > { %v716_v0 = vpop.xlane.xlu2 %715  ;;  %v710_v32 = vpop.xlane.xlu0 %709  ;;  %v801_v30 = vmul.f32 %v1216_v29, %v785_v2 }
 0x1f8   : > { %v815_v1 = vmul.f32 %v1609_v38, %v716_v0  ;;  %v704_v55 = vpop.xlane.xlu1 %703  ;;  %v813_v3 = vmul.f32 %v1609_v38, %v710_v32  ;;  %v771_v0 = vmul.f32 %v1218_v24, %v1611_v44 }
 0x1f9   : > { %v811_v8 = vmul.f32 %v1609_v38, %v704_v55 }
 0x1fa   : > { %v1626_v33 = vmul.f32 %v815_v1, %v798_v62  ;;  %v1628_v54 = vmul.f32 %v813_v3, %v796_v61  ;;  %v1220_v62 = vpop.eup %1219  ;;  %v800_v1 = vmul.f32 %v1212_v15, %v784_v37  ;;  %v787_v19 = vsub.f32 2.0, %v771_v0 }
 0x1fb   : > { %v827_v12 = vmul.f32 %v811_v8, %v794_v47  ;;  %v1222_v31 = vpop.eup %1221  ;;  %v772_v15 = vmul.f32 %v1220_v62, %v1599_v27 }
 0x1fc   : > { %v876_v9 = vperm.slane %v1626_v33, %v1614_v46  ;;  %v873_v45 = vperm.slane %v1628_v54, %v1614_v46  ;;  %v1224_v11 = vpop.eup %1223  ;;  %v773_v18 = vmul.f32 %v1222_v31, %v1605_v35  ;;  %v803_v29 = vmul.f32 %v1218_v24, %v787_v19  ;;  %v1159_v19 = vld [vmem:[%s1761_s3] ss:$0 sm:$0xff] }
 0x1fd   : > { %v870_v58 = vperm.slane %v827_v12, %v1614_v46  ;;  %v1226_v14 = vpop.eup %1225  ;;  %v775_v36 = vmul.f32 %v1224_v11, %v1617_v50  ;;  %v788_v8 = vsub.f32 2.0, %v772_v15  ;;  %v961_v15 = vld [vmem:[%s1764_s6 + $0x10] sm:$0xff] }
 0x1ff   : > { %v1636_v17 = vpop.xlane.xlu2 %733  ;;  %v728_v23 = vpop.xlane.xlu0 %727  ;;  %v791_v47 = vsub.f32 2.0, %v775_v36 }
 0x200   : > { %v722_v20 = vpop.xlane.xlu1 %721  ;;  %v819_v40 = vmul.f32 %v1609_v38, %v728_v23  ;;  %v821_v28 = vmul.f32 %v1609_v38, %v1636_v17 }
 0x201   : > { %v817_v41 = vmul.f32 %v1609_v38, %v722_v20 }
 0x202   : > { %v1647_v16 = vmul.f32 %v819_v40, %v802_v4  ;;  %v799_v4 = vmul.f32 %v1214_v25, %v783_v59 }
 0x203   : > { %v833_v35 = vmul.f32 %v817_v41, %v800_v1 }
 0x204   : > { %v882_v21 = vperm.slane %v1647_v16, %v1614_v46 }
 0x207   : > { %v707_v63 = vpop.xlane.xlu2 %706  ;;  %v701_v48 = vpop.xlane.xlu0 %700 }
 0x208   : > { %v812_v56 = vmul.f32 %v1609_v38, %v707_v63  ;;  %v713_v61 = vpop.xlane.xlu1 %712  ;;  %v810_v49 = vmul.f32 %v1609_v38, %v701_v48  ;;  %v804_v48 = vmul.f32 %v1220_v62, %v788_v8 }
 0x209   : > { %v814_v32 = vmul.f32 %v1609_v38, %v713_v61 }
 0x20a   : > { %v828_v55 = vmul.f32 %v812_v56, %v795_v53  ;;  %v826_v3 = vmul.f32 %v810_v49, %v793_v43  ;;  %v879_v43 = vperm.slane %v833_v35, %v1614_v46  ;;  %v807_v56 = vmul.f32 %v1224_v11, %v791_v47 }
 0x20b   : > { %v830_v7 = vmul.f32 %v814_v32, %v797_v5  ;;  %v837_v32 = vmul.f32 %v821_v28, %v804_v48 }
 0x20c   : > { %v871_v13 = vperm.slane %v828_v55, %v1659_v39  ;;  %v867_v44 = vperm.slane %v826_v3, %v1659_v39 }
 0x20d   : > { %v874_v23 = vperm.slane %v830_v7, %v1659_v39  ;;  %v885_v16 = vperm.slane %v837_v32, %v1614_v46 }
 0x20e   : > { %v872_v40 = vsel %vm868_vm1, %v871_v13, %v870_v58  ;;  %v869_v20 = vsel %vm868_vm1, %v867_v44, %v865_v57  ;;  %v774_v57 = vmul.f32 %v1226_v14, %v1601_v60 }
 0x20f   : > { %v875_v27 = vsel %vm868_vm1, %v874_v23, %v873_v45  ;;  %v892_v6 = vsel %vm891_vm2, %v872_v40, %v869_v20  ;;  %v725_v22 = vpop.xlane.xlu2 %724  ;;  %v719_v42 = vpop.xlane.xlu0 %718  ;;  %v789_v45 = vsub.f32 2.0, %v773_v18  ;;  %v960_v18 = vld [vmem:[%s1764_s6 + $0x8] sm:$0xff]  ;;  %v959_v40 = vld [vmem:[%s1764_s6] sm:$0xff] }
 0x210   : > { %v818_v25 = vmul.f32 %v1609_v38, %v725_v22  ;;  %v731_v26 = vpop.xlane.xlu1 %730  ;;  %v816_v52 = vmul.f32 %v1609_v38, %v719_v42  ;;  %v894_v34 = vsel %vm893_vm3, %v875_v27, %v892_v6  ;;  %v790_v60 = vsub.f32 2.0, %v774_v57  ;;  %v1160_v20 = vld [vmem:[%s1763_s5] ss:$0 sm:$0xff]  ;;  %v992_v27 = vld [vmem:[%s1766_s8 + $0x8] sm:$0xff] }
 0x211   : > { %v820_v50 = vmul.f32 %v1609_v38, %v731_v26  ;;  %v805_v17 = vmul.f32 %v1222_v31, %v789_v45  ;;  %v991_v6 = vld [vmem:[%s1766_s8] sm:$0xff]  ;;  %1014 = vmatpush.msra.mxu3 %v992_v27 }
 0x212   : > { %v834_v54 = vmul.f32 %v818_v25, %v801_v30  ;;  %v832_v51 = vmul.f32 %v816_v52, %v799_v4  ;;  %v1161_v22 = vld [vmem:[%s1765_s7] ss:$0 sm:$0xff] }
 0x213   : > { %v836_v37 = vmul.f32 %v820_v50, %v803_v29  ;;  %1015 = vmatpush.msra.mxu3 %v991_v6  ;;  %v1162_v26 = vld [vmem:[%s1767_s9] ss:$0 sm:$0xff] }
 0x214   : > { %v880_v10 = vperm.slane %v834_v54, %v1659_v39  ;;  %v877_v63 = vperm.slane %v832_v51, %v1659_v39 }
 0x215   : > { %v883_v24 = vperm.slane %v836_v37, %v1659_v39 }
 0x216   : > { %v881_v53 = vsel %vm868_vm1, %v880_v10, %v879_v43  ;;  %v878_v12 = vsel %vm868_vm1, %v877_v63, %v876_v9  ;;  %v806_v9 = vmul.f32 %v1226_v14, %v790_v60  ;;  %v928_v14 = vld [vmem:[%s1762_s4 + $0x8] sm:$0xff] }
 0x217   : > { %v743_v61 = vpop.xlane.xlu2 %742  ;;  %v737_v49 = vpop.xlane.xlu0 %736  ;;  %v884_v5 = vsel %vm868_vm1, %v883_v24, %v882_v21  ;;  %v896_v0 = vsel %vm895_vm4, %v878_v12, %v894_v34  ;;  %953 = vmatpush.msra.mxu1 %v928_v14 }
 0x218   : > { %v824_v62 = vmul.f32 %v1609_v38, %v743_v61  ;;  %v740_v1 = vpop.xlane.xlu1 %739  ;;  %v822_v33 = vmul.f32 %v1609_v38, %v737_v49  ;;  %v898_v59 = vsel %vm897_vm5, %v881_v53, %v896_v0 }
 0x219   : > { %v823_v55 = vmul.f32 %v1609_v38, %v740_v1  ;;  %v900_v3 = vsel %vm899_vm6, %v884_v5, %v898_v59 }
 0x21a   : > { %v840_v31 = vmul.f32 %v824_v62, %v807_v56  ;;  %v838_v2 = vmul.f32 %v822_v33, %v805_v17 }
 0x21b   : > { %v839_v7 = vmul.f32 %v823_v55, %v806_v9 }
 0x21c   : > { %v889_v21 = vperm.slane %v840_v31, %v1659_v39  ;;  %v886_v11 = vperm.slane %v838_v2, %v1659_v39  ;;  %v927_v39 = vld [vmem:[%s1762_s4] sm:$0xff] }
 0x21d   : > { %v888_v58 = vperm.slane %v839_v7, %v1614_v46  ;;  %v962_v46 = vld [vmem:[%s1764_s6 + $0x18] sm:$0xff]  ;;  %954 = vmatpush.msra.mxu1 %v927_v39 }
 0x21e   : > { %v887_v41 = vsel %vm868_vm1, %v886_v11, %v885_v16  ;;  %982 = vmatpush.msra.mxu2 %v962_v46 }
 0x21f   : > { %v890_v13 = vsel %vm868_vm1, %v889_v21, %v888_v58  ;;  %v902_v44 = vsel %vm901_vm7, %v887_v41, %v900_v3 }
 0x220   : > { %v904_v38 = vsel %vm903_vm8, %v890_v13, %v902_v44  ;;  %983 = vmatpush.msra.mxu2 %v961_v15 }
 0x221   : > { %1111 = vmatmul.msk.f32.vlgmr.msra.gmra.mxu0 %vm535_vm0, %v904_v38 }
 0x222   : > { %984 = vmatpush.msra.mxu2 %v960_v18 }
 0x224   : > { %985 = vmatpush.msra.mxu2 %v959_v40 }
 0x29e   : > { %v924_v23 = vpop.f32.mrf.mxu0 }
 0x29f   : > { %v925_v4 = vadd.f32 %v1159_v19, %v924_v23 }
 0x2a1   : > { %1112 = vmatmul.msk.f32.vlgmr.msra.gmra.mxu1 %vm935_vm9, %v925_v4 }
 0x31e   : > { %v956_v30 = vpop.f32.mrf.mxu1 }
 0x31f   : > { %v957_v36 = vadd.f32 %v1160_v20, %v956_v30 }
 0x321   : > { %1113 = vmatmul.msk.f32.vlgmr.msra.gmra.mxu2 %vm935_vm9, %v957_v36 }
 0x3a4   : > { %v987_v42 = vpop.f32.mrf.mxu2 }
 0x3a5   : > { %v988_v35 = vadd.f32 %v1161_v22, %v987_v42 }
 0x3a7   : > { %v990_v25 = vmax.f32 %v988_v35, 0.0 }
 0x3a9   : > { %1114 = vmatmul.msk.f32.vlgmr.msra.gmra.mxu3 %vm535_vm0, %v990_v25 }
 0x42c   : > { %v1017_v52 = vpop.f32.mrf.mxu3 }
 0x42d   : > { %v1018_v34 = vadd.f32 %v1162_v26, %v1017_v52 }
 0x42f   : > { %1021 = vst.msk [vmem:[%s385_s29] sm:$0xff] %vm1020_vm10, %v1018_v34 }
 0x430 PF: > { %s22_s13 = sadd.s32 1, %s1286_s13  }
 0x431   : > { %p19_p7 = scmp.ge.s32.totalorder %s22_s13, 4  }
 0x433   :  { %21 = sbr.rel (!%p19_p7) target bundleno = 2 (0x2), region = 100 }
 0x438   :  { %1041 = vsyncpa [#allocation3], 1 }
 0x439   :  { %1043 = vsyncpa [#allocation3 + $0x1], 1 }
 0x43a   :  { %1044 = vsyncpa [#allocation4], 1 }
 0x43b   :  { %1046 = vsyncpa [#allocation4 + $0x1], 1 }

</bundles_post_ra>
